<compile_context>
chip_gen: v6e
topology: v6e:2x2x1
jax: 0.10.0
libtpu: 0.0.40
codegen_flags: <defaults>
</compile_context>

<pallas_src>
import jax
import jax.numpy as jnp
from jax import lax
from jax.experimental import pallas as pl
from jax.experimental.pallas import tpu as pltpu


_TL_MAX = 8192                 # max spatial (lane) tile; multiple of 128
_TB_MAX = 16                   # max images folded into one grid step (unroll bound)
_BLOCK_BYTES_TARGET = 8 << 20  # target bytes of (patch + out) blocks per grid step
_VMEM_LIMIT = 32 << 20         # explicit scoped-VMEM limit (>= any footprint built here)


def _conv_matmul_kernel(w_ref, b_ref, p_ref, o_ref):
    # w_ref: [Cout, Kp]   conv weight, VMEM-resident across the whole grid
    # b_ref: [Cout, 1]    bias, VMEM-resident
    # p_ref: [TB, Kp, TL] im2col patch tile (output-spatial in lanes)
    # o_ref: [TB, Cout, TL] output tile (lane-dense)
    w = w_ref[...]
    b = b_ref[...]
    for bb in range(p_ref.shape[0]):                      # static unroll over folded batch
        acc = jnp.dot(w, p_ref[bb], preferred_element_type=jnp.float32)
        o_ref[bb] = (acc + b).astype(o_ref.dtype)         # lean epilogue: add + cast + store


def _im2col_transposed(x, kh, kw, k_pad):
    """x: [N, C, H, W] -> P: [N, k_pad, OH*OW].

    Rows ordered (c, i, j) to match weight.reshape(Cout, C*kh*kw); rows >= C*kh*kw are zero.
    """
    N, C, H, W = x.shape
    OH, OW = H - kh + 1, W - kw + 1
    taps = [x[:, :, i:i + OH, j:j + OW] for i in range(kh) for j in range(kw)]
    p = jnp.stack(taps, axis=2)                 # [N, C, kh*kw, OH, OW]
    p = p.reshape(N, C * kh * kw, OH * OW)      # contiguous merges only
    k = C * kh * kw
    if k_pad > k:
        p = jnp.pad(p, ((0, 0), (0, k_pad - k), (0, 0)))
    return p, OH, OW


def _largest_divisor_leq(n, cap):
    cap = max(1, min(n, cap))
    for d in range(cap, 0, -1):
        if n % d == 0:
            return d
    return 1


def mlp_layer_forward(x, weight, bias):
    """Conv2d(3, 64, 3) forward. x: [N,3,H,W] f32; weight: [64,3,3,3]; bias: [64]. Returns NCHW f32."""
    N, C, H, W = x.shape
    Cout, Cin, KH, KW = weight.shape
    assert C == Cin
    K = Cin * KH * KW
    Kp = ((K + 7) // 8) * 8                                  # 27 -> 32 (sublane aligned)

    patches, OH, OW = _im2col_transposed(x, KH, KW, Kp)      # [N, Kp, L]
    L = OH * OW

    w_mat = jnp.pad(weight.reshape(Cout, K), ((0, 0), (0, Kp - K)))   # [Cout, Kp]
    b_mat = bias.reshape(Cout, 1)                                     # [Cout, 1]

    # ---- tiling ---------------------------------------------------------------------------
    # Lane tile: full L (full-dim exemption) when it fits, else a 128-multiple tile; Pallas
    # masks the ragged tail block (output columns are independent).
    tl = L if L <= _TL_MAX else _TL_MAX
    num_l = pl.cdiv(L, tl)

    # Batch fold: when one image is a single lane tile, put TB images in each block so grid
    # steps stay large (amortizes per-step overhead, keeps DMAs big and contiguous).
    if num_l == 1:
        per_image_bytes = (Kp + Cout) * L * 4
        tb = _largest_divisor_leq(
            N, min(_TB_MAX, max(1, _BLOCK_BYTES_TARGET // per_image_bytes)))
        if N // tb < 2 <= N:     # keep >= 2 parallel grid cells for v7x's two TensorCores
            tb = _largest_divisor_leq(N, max(1, N // 2))
    else:
        tb = 1
    grid = (N // tb, num_l)

    flops = 2 * N * L * Kp * Cout
    bytes_accessed = (patches.size + w_mat.size + b_mat.size + N * Cout * L) * 4

    out_flat = pl.pallas_call(
        _conv_matmul_kernel,
        out_shape=jax.ShapeDtypeStruct((N, Cout, L), jnp.float32),
        grid=grid,
        in_specs=[
            pl.BlockSpec((Cout, Kp), lambda n, l: (0, 0)),        # weight: VMEM resident
            pl.BlockSpec((Cout, 1), lambda n, l: (0, 0)),         # bias:   VMEM resident
            pl.BlockSpec((tb, Kp, tl), lambda n, l: (n, 0, l)),   # patch tile (batch folded)
        ],
        out_specs=pl.BlockSpec((tb, Cout, tl), lambda n, l: (n, 0, l)),
        compiler_params=pltpu.CompilerParams(
            dimension_semantics=("parallel", "parallel"),
            vmem_limit_bytes=_VMEM_LIMIT,
        ),
        cost_estimate=pl.CostEstimate(
            flops=flops, transcendentals=0, bytes_accessed=bytes_accessed),
    )(w_mat, b_mat, patches)

    # [N, Cout, OH*OW] -> [N, Cout, OH, OW]: contiguous reshape, already NCHW (no transpose).
    return out_flat.reshape(N, Cout, OH, OW)


if __name__ == "__main__":
    key = jax.random.PRNGKey(0)
    kx, kw_, kb = jax.random.split(key, 3)

    # Small, module-consistent shapes: batch=2, in_channels=3, spatial=16x16.
    N, Cin, H, W = 2, 3, 16, 16
    Cout, KH, KW = 64, 3, 3

    x = jax.random.normal(kx, (N, Cin, H, W), dtype=jnp.float32)
    fan_in = Cin * KH * KW
    bound = 1.0 / (fan_in ** 0.5)
    weight = jax.random.uniform(kw_, (Cout, Cin, KH, KW), jnp.float32, -bound, bound)
    bias = jax.random.uniform(kb, (Cout,), jnp.float32, -bound, bound)

    fwd = jax.jit(mlp_layer_forward)
    out = jax.block_until_ready(fwd(x, weight, bias))

    # Cross-check against XLA's conv (highest precision) to match PyTorch Conv2d semantics.
    ref = lax.conv_general_dilated(
        x, weight, window_strides=(1, 1), padding="VALID",
        dimension_numbers=("NCHW", "OIHW", "NCHW"),
        precision=lax.Precision.HIGHEST) + bias.reshape(1, Cout, 1, 1)
    assert out.shape == (N, Cout, H - KH + 1, W - KW + 1)
    # Tolerance leaves margin for MXU accumulation-order / precision differences;
    # any real indexing/layout bug would show up as O(1) errors.
    assert jnp.allclose(out, ref, atol=5e-3, rtol=5e-3), float(jnp.max(jnp.abs(out - ref)))

    print("KERNEL_OK")
</pallas_src>

<mosaic_0001>
module attributes {stable_mosaic.version = 11 : i64} {
  func.func @_conv_matmul_kernel(%arg0: i32, %arg1: i32, %arg2: memref<64x32xf32, #tpu.memory_space<vmem>>, %arg3: memref<64x1xf32, #tpu.memory_space<vmem>>, %arg4: memref<1x32x196xf32, #tpu.memory_space<vmem>>, %arg5: memref<1x64x196xf32, #tpu.memory_space<vmem>>) attributes {dimension_semantics = [#tpu.dimension_semantics<parallel>, #tpu.dimension_semantics<parallel>], iteration_bounds = array<i64: 2, 1>, scalar_prefetch = 0 : i64, scratch_operands = 0 : i64, tpu.core_type = #tpu.core_type<tc>, window_params = [{pipeline_mode = #tpu.pipeline_mode<synchronous>, transform_indices = @transform_0, window_bounds = array<i64: 64, 32>}, {pipeline_mode = #tpu.pipeline_mode<synchronous>, transform_indices = @transform_1, window_bounds = array<i64: 64, 1>}, {transform_indices = @transform_2, window_bounds = array<i64: 1, 32, 196>}, {transform_indices = @transform_3, window_bounds = array<i64: 1, 64, 196>}]} {
    %c0 = arith.constant 0 : index
    %c0_0 = arith.constant 0 : index
    %0 = vector.load %arg2[%c0, %c0_0] : memref<64x32xf32, #tpu.memory_space<vmem>>, vector<64x32xf32>
    %c0_1 = arith.constant 0 : index
    %c0_2 = arith.constant 0 : index
    %1 = vector.load %arg3[%c0_1, %c0_2] : memref<64x1xf32, #tpu.memory_space<vmem>>, vector<64x1xf32>
    %c0_3 = arith.constant 0 : index
    %c0_4 = arith.constant 0 : index
    %c0_5 = arith.constant 0 : index
    %2 = vector.load %arg4[%c0_3, %c0_4, %c0_5] : memref<1x32x196xf32, #tpu.memory_space<vmem>>, vector<1x32x196xf32>
    %3 = vector.shape_cast %2 : vector<1x32x196xf32> to vector<32x196xf32>
    %cst = arith.constant dense<0.000000e+00> : vector<64x196xf32>
    %4 = tpu.matmul %0, %3, %cst {dimension_numbers = #tpu.dot_dimension_numbers<[1], [0], [0], [1], [0, 0, 1, 1], [], []>} : vector<64x32xf32>, vector<32x196xf32>, vector<64x196xf32> -> vector<64x196xf32>
    %5 = vector.broadcast %1 : vector<64x1xf32> to vector<64x196xf32>
    %6 = arith.addf %4, %5 : vector<64x196xf32>
    %c0_6 = arith.constant 0 : index
    %c0_7 = arith.constant 0 : index
    %c0_8 = arith.constant 0 : index
    %7 = vector.load %arg5[%c0_6, %c0_7, %c0_8] : memref<1x64x196xf32, #tpu.memory_space<vmem>>, vector<1x64x196xf32>
    %8 = vector.shape_cast %7 : vector<1x64x196xf32> to vector<64x196xf32>
    %9 = vector.shape_cast %6 : vector<64x196xf32> to vector<1x64x196xf32>
    tpu.vector_store %arg5[%c0_6, %c0_7, %c0_8], %9 {strides = array<i32>} : memref<1x64x196xf32, #tpu.memory_space<vmem>>, vector<1x64x196xf32>,
    return
  }
  func.func @transform_0(%arg0: i32, %arg1: i32) -> (i32, i32) {
    %c0_i32 = arith.constant 0 : i32
    %c0_i32_0 = arith.constant 0 : i32
    %c0_i32_1 = arith.constant 0 : i32
    return %c0_i32, %c0_i32_0 : i32, i32
  }
  func.func @transform_1(%arg0: i32, %arg1: i32) -> (i32, i32) {
    %c0_i32 = arith.constant 0 : i32
    %c0_i32_0 = arith.constant 0 : i32
    %c0_i32_1 = arith.constant 0 : i32
    return %c0_i32, %c0_i32_0 : i32, i32
  }
  func.func @transform_2(%arg0: i32, %arg1: i32) -> (i32, i32, i32) {
    %c0_i32 = arith.constant 0 : i32
    %c0_i32_0 = arith.constant 0 : i32
    return %arg0, %c0_i32, %arg1 : i32, i32, i32
  }
  func.func @transform_3(%arg0: i32, %arg1: i32) -> (i32, i32, i32) {
    %c0_i32 = arith.constant 0 : i32
    %c0_i32_0 = arith.constant 0 : i32
    return %arg0, %c0_i32, %arg1 : i32, i32, i32
  }
}

</mosaic_0001>

<bundles_post_ra>
// kernel: mlp_layer_forward.1
= control target key start
LH: loop header
LB: loop body
LE: loop exit
PB: predicated region body
PF: predicated region fallthrough
CT: control target
= control target key end

     0   :  { %s619_s12 = smov 0   ;;  %s621_s13 = smov 0   ;;  %s746_s0 = inlined_call_operand.vmem [shape: f32[64,32], index: 0, kind: input, shape index: {}]   ;;  %s747_s1 = inlined_call_operand.vmem [shape: f32[64,1], index: 1, kind: input, shape index: {}]   ;;  %s748_s2 = inlined_call_operand.vmem [shape: f32[2,32,196], index: 2, kind: input, shape index: {}]   ;;  %s749_s3 = inlined_call_operand.vmem [shape: f32[2,64,196], index: 3, kind: output, shape index: {}]  }
   0x1   :  { %s623_s14 = smov 0  }
   0x2 LB: > { %s25_s15 = sadd.s32 1, %s591_s13  ;;  %p520_p0 = scmp.ge.s32.totalorder %s595_s14, 1  ;;  %s595_s14 = sphi %s623_s14, %s13_s14   ;;  %s591_s13 = sphi %s621_s13, %s751_s13   ;;  %s587_s12 = sphi %s619_s12, %s750_s12  }
   0x3   : > { %p27_p1 = scmp.ge.s32.totalorder %s25_s15, 2  ;;  %p158_p2 = scmp.lt.s32.totalorder %s595_s14, 3 }
   0x5   : > { %s753_s15 = smov (%p27_p1, %s25_s15), 0  ;;  %p159_p3 = pnand %p520_p0, %p158_p2 }
   0x6   : > { %p191_p4 = scmp.lt.s32.totalorder (!%p159_p3), %s587_s12, 1 }
   0x7   : > { %162 = sbr.rel (%p159_p3) target bundleno = 234 (0xea), region = 32 }
   0xc   : > { %v597_v0 = vmov 0.0   ;;  %s755_s12 = smov (!%p191_p4, %s587_s12), 1  ;;  %v598_v1 = vmov 0   ;;  %v220_v2 = vld [vmem:[%s747_s1 + $0x10] sm:$0xff]  ;;  %v218_v3 = vld [vmem:[%s747_s1] sm:$0xff]  ;;  %vm274_vm0 = vcmask 261120  }
   0xd   : > { %363 = vmatprep.mubr.f32.mxu0 %v597_v0  ;;  %387 = vmatprep.mubr.f32.mxu1 %v597_v0  ;;  %s535_s20 = sshll.u32 %s755_s12, 6  ;;  %v210_v12 = vld [vmem:[%s746_s0] sm:$0xff]  ;;  %v221_v14 = vld [vmem:[%s747_s1 + $0x18] sm:$0xff]  ;;  %v219_v15 = vld [vmem:[%s747_s1 + $0x8] sm:$0xff]  ;;  %s536_s29 = sshll.u32 %s755_s12, 7  ;;  %vm413_vm1 = vcmask 556032  }
   0xe   : > { %572 = vset.pattern.permute.xlu1 %v598_v1  ;;  %571 = vset.pattern.permute.xlu0 %v598_v1  ;;  %s198_s23 = scalar_lea.vmem %s748_s2, %s535_s20  ;;  %v214_v13 = vld [vmem:[%s746_s0 + $0x20] sm:$0xff]  ;;  %v211_v16 = vld [vmem:[%s746_s0 + $0x8] sm:$0xff]  ;;  %v212_v20 = vld [vmem:[%s746_s0 + $0x10] sm:$0xff]  ;;  %s711_s5 = scalar_lea.vmem %s749_s3, %s536_s29 }
   0xf   : > { %246 = vperm.xlu1 %572, %v220_v2   ;;  %236 = vperm.xlu0 %571, %v218_v3   ;;  %v233_v4 = vld [vmem:[%s198_s23 + $0x38] sm:$0xff]  ;;  %v232_v5 = vld [vmem:[%s198_s23 + $0x30] sm:$0xff]  ;;  %v231_v6 = vld [vmem:[%s198_s23 + $0x28] sm:$0xff] }
  0x10   : > { %323 = vmatprep.subr.mxu0 %v233_v4  ;;  %537 = vmatprep.subr.mxu1 %v233_v4  ;;  %v230_v7 = vld [vmem:[%s198_s23 + $0x20] sm:$0xff]  ;;  %v229_v8 = vld [vmem:[%s198_s23 + $0x18] sm:$0xff]  ;;  %v228_v9 = vld [vmem:[%s198_s23 + $0x10] sm:$0xff] }
  0x11   : > { %324 = vmatpush1.msra.mxu0 %v232_v5  ;;  %541 = vmatpush1.msra.mxu1 %v232_v5  ;;  %v227_v10 = vld [vmem:[%s198_s23 + $0x8] sm:$0xff]  ;;  %v226_v11 = vld [vmem:[%s198_s23] sm:$0xff]  ;;  %v216_v21 = vld [vmem:[%s746_s0 + $0x30] sm:$0xff] }
  0x12   : > { %325 = vmatprep.subr.mxu0 %v231_v6  ;;  %538 = vmatprep.subr.mxu1 %v231_v6  ;;  %v215_v17 = vld [vmem:[%s746_s0 + $0x28] sm:$0xff]  ;;  %v222_v19 = vld [vmem:[%s747_s1 + $0x20] sm:$0xff]  ;;  %v225_v22 = vld [vmem:[%s747_s1 + $0x38] sm:$0xff] }
  0x13   : > { %326 = vmatpush1.msra.mxu0 %v230_v7  ;;  %542 = vmatpush1.msra.mxu1 %v230_v7  ;;  %v223_v18 = vld [vmem:[%s747_s1 + $0x28] sm:$0xff]  ;;  %v224_v23 = vld [vmem:[%s747_s1 + $0x30] sm:$0xff]  ;;  %v213_v24 = vld [vmem:[%s746_s0 + $0x18] sm:$0xff] }
  0x14   : > { %327 = vmatprep.subr.mxu0 %v229_v8  ;;  %539 = vmatprep.subr.mxu1 %v229_v8  ;;  %v217_v25 = vld [vmem:[%s746_s0 + $0x38] sm:$0xff] }
  0x15   : > { %328 = vmatpush1.msra.mxu0 %v228_v9  ;;  %543 = vmatpush1.msra.mxu1 %v228_v9 }
  0x16   : > { %329 = vmatprep.subr.mxu0 %v227_v10  ;;  %540 = vmatprep.subr.mxu1 %v227_v10 }
  0x17   : > { %330 = vmatpush1.msra.mxu0 %v226_v11  ;;  %544 = vmatpush1.msra.mxu1 %v226_v11 }
  0x18   : > { %525 = vmatmul.mubr.msk.f32.vlgmr.msra.gmra.mxu0 %vm274_vm0, %v210_v12  ;;  %529 = vmatmul.mubr.msk.f32.vlgmr.msra.gmra.mxu1 %vm274_vm0, %v214_v13 }
  0x19   : > { %369 = vmatprep.mubr.f32.mxu0 %v597_v0  ;;  %393 = vmatprep.mubr.f32.mxu1 %v597_v0 }
  0x1a   : > { %251 = vperm.xlu1 %572, %v221_v14   ;;  %241 = vperm.xlu0 %571, %v219_v15  }
  0x1c   : > { %526 = vmatmul.mubr.msk.f32.gmra.mxu0 %vm274_vm0, %v211_v16  ;;  %530 = vmatmul.mubr.msk.f32.gmra.mxu1 %vm274_vm0, %v215_v17 }
  0x1d   : > { %375 = vmatprep.mubr.f32.mxu0 %v597_v0  ;;  %399 = vmatprep.mubr.f32.mxu1 %v597_v0 }
  0x1e   : > { %261 = vperm.xlu1 %572, %v223_v18   ;;  %256 = vperm.xlu0 %571, %v222_v19  }
  0x20   : > { %527 = vmatmul.mubr.msk.f32.gmra.mxu0 %vm274_vm0, %v212_v20  ;;  %531 = vmatmul.mubr.msk.f32.gmra.mxu1 %vm274_vm0, %v216_v21 }
  0x21   : > { %381 = vmatprep.mubr.f32.mxu0 %v597_v0  ;;  %405 = vmatprep.mubr.f32.mxu1 %v597_v0 }
  0x22   : > { %271 = vperm.xlu1 %572, %v225_v22   ;;  %266 = vperm.xlu0 %571, %v224_v23  }
  0x24   : > { %528 = vmatmul.mubr.msk.f32.gmra.mxu0 %vm274_vm0, %v213_v24  ;;  %532 = vmatmul.mubr.msk.f32.gmra.mxu1 %vm274_vm0, %v217_v25 }
  0x8a   : > { %v237_v26 = vpop.permute.xlu0 %236  ;;  %v247_v27 = vpop.permute.xlu1 %246 }
  0x95   : > { %v242_v28 = vpop.permute.xlu0 %241  ;;  %v252_v29 = vpop.permute.xlu1 %251 }
  0x99   : > { %v257_v30 = vpop.permute.xlu0 %256  ;;  %v262_v37 = vpop.permute.xlu1 %261 }
  0x9d   : > { %v267_v46 = vpop.permute.xlu0 %266  ;;  %v272_v55 = vpop.permute.xlu1 %271 }
  0xd8   : > { %v365_v31 = vpop.f32.mrf.mxu0  ;;  %v389_v32 = vpop.f32.mrf.mxu1 }
  0xd9   : > { %v366_v33 = vadd.f32 %v365_v31, %v237_v26  ;;  %v390_v34 = vadd.f32 %v389_v32, %v257_v30 }
  0xda   : > { %v367_v35 = vpop.f32.mrf.mxu0  ;;  %v391_v36 = vpop.f32.mrf.mxu1 }
  0xdb   : > { %412 = vst [vmem:[%s711_s5] sm:$0xff] %v366_v33  ;;  %421 = vst [vmem:[%s711_s5 + $0x40] sm:$0xff] %v390_v34  ;;  %v368_v38 = vadd.f32 %v367_v35, %v237_v26  ;;  %v392_v39 = vadd.f32 %v391_v36, %v257_v30 }
  0xdc   : > { %v371_v40 = vpop.f32.mrf.mxu0  ;;  %v395_v41 = vpop.f32.mrf.mxu1 }
  0xdd   : > { %414 = vst.msk [vmem:[%s711_s5 + $0x8] sm:$0xff] %vm413_vm1, %v368_v38  ;;  %422 = vst.msk [vmem:[%s711_s5 + $0x48] sm:$0xff] %vm413_vm1, %v392_v39  ;;  %v372_v42 = vadd.f32 %v371_v40, %v242_v28  ;;  %v396_v43 = vadd.f32 %v395_v41, %v262_v37 }
  0xde   : > { %v373_v44 = vpop.f32.mrf.mxu0  ;;  %v397_v45 = vpop.f32.mrf.mxu1 }
  0xdf   : > { %415 = vst [vmem:[%s711_s5 + $0x10] sm:$0xff] %v372_v42  ;;  %423 = vst [vmem:[%s711_s5 + $0x50] sm:$0xff] %v396_v43  ;;  %v374_v47 = vadd.f32 %v373_v44, %v242_v28  ;;  %v398_v48 = vadd.f32 %v397_v45, %v262_v37 }
  0xe0   : > { %v377_v49 = vpop.f32.mrf.mxu0  ;;  %v401_v50 = vpop.f32.mrf.mxu1 }
  0xe1   : > { %416 = vst.msk [vmem:[%s711_s5 + $0x18] sm:$0xff] %vm413_vm1, %v374_v47  ;;  %424 = vst.msk [vmem:[%s711_s5 + $0x58] sm:$0xff] %vm413_vm1, %v398_v48  ;;  %v378_v51 = vadd.f32 %v377_v49, %v247_v27  ;;  %v402_v52 = vadd.f32 %v401_v50, %v267_v46 }
  0xe2   : > { %v379_v53 = vpop.f32.mrf.mxu0  ;;  %v403_v54 = vpop.f32.mrf.mxu1 }
  0xe3   : > { %417 = vst [vmem:[%s711_s5 + $0x20] sm:$0xff] %v378_v51  ;;  %425 = vst [vmem:[%s711_s5 + $0x60] sm:$0xff] %v402_v52  ;;  %v380_v56 = vadd.f32 %v379_v53, %v247_v27  ;;  %v404_v57 = vadd.f32 %v403_v54, %v267_v46 }
  0xe4   : > { %v383_v58 = vpop.f32.mrf.mxu0  ;;  %v407_v59 = vpop.f32.mrf.mxu1 }
  0xe5   : > { %418 = vst.msk [vmem:[%s711_s5 + $0x28] sm:$0xff] %vm413_vm1, %v380_v56  ;;  %426 = vst.msk [vmem:[%s711_s5 + $0x68] sm:$0xff] %vm413_vm1, %v404_v57  ;;  %v384_v60 = vadd.f32 %v383_v58, %v252_v29  ;;  %v408_v61 = vadd.f32 %v407_v59, %v272_v55 }
  0xe6   : > { %v385_v62 = vpop.f32.mrf.mxu0  ;;  %v409_v63 = vpop.f32.mrf.mxu1 }
  0xe7   : > { %419 = vst [vmem:[%s711_s5 + $0x30] sm:$0xff] %v384_v60  ;;  %427 = vst [vmem:[%s711_s5 + $0x70] sm:$0xff] %v408_v61  ;;  %v386_v0 = vadd.f32 %v385_v62, %v252_v29  ;;  %v410_v1 = vadd.f32 %v409_v63, %v272_v55 }
  0xe9   : > { %420 = vst.msk [vmem:[%s711_s5 + $0x38] sm:$0xff] %vm413_vm1, %v386_v0  ;;  %428 = vst.msk [vmem:[%s711_s5 + $0x78] sm:$0xff] %vm413_vm1, %v410_v1 }
  0xea PF: > { %s13_s14 = sadd.s32 1, %s595_s14   ;;  %s750_s12 = smov %s591_s13 }
  0xeb   : > { %p10_p5 = scmp.ge.s32.totalorder %s13_s14, 4   ;;  %s751_s13 = smov %s753_s15 }
  0xed   :  { %12 = sbr.rel (!%p10_p5) target bundleno = 2 (0x2), region = 62 }

</bundles_post_ra>
